<compile_context>
chip_gen: v7x
topology: tpu7x:2x2x1
jax: 0.10.0
libtpu: 0.0.40
codegen_flags: <defaults>
</compile_context>

<pallas_src>
from functools import partial

import jax
import jax.numpy as jnp
from jax.experimental import pallas as pl
from jax.experimental.pallas import tpu as pltpu


def _round_up(x, m):
    return (x + m - 1) // m * m


def _num_tensorcores():
    """2 TensorCores on v7x, otherwise 1 (v5e/v6e). Safe fallback = 1."""
    try:
        kind = jax.devices()[0].device_kind.lower()
    except Exception:
        return 1
    return 2 if ("v7" in kind or "7x" in kind) else 1


def _select_tile(batch, num_cores):
    # v5e/v6e (1 TC): every grid step is ~0.35us of pure serial overhead and
    # the per-tile activations/weights are KBs vs. the scoped VMEM limit, so
    # use one big tile (capped at 4096 rows before tiling).
    # v7x (2 TC): one tile per TensorCore once the batch is worth splitting.
    if num_cores >= 2 and batch >= 256:
        return _round_up(pl.cdiv(batch, num_cores), 128)
    return min(_round_up(batch, 16), 4096)


def _qmlp_kernel(x_ref, w1_ref, b1_ref, w2_ref, b2_ref, w3_ref, b3_ref,
                 out_ref):
    # Layer 1: (TB, A+S) f32 @ (A+S, H1) -> f32, + b1, ReLU.
    h = jnp.dot(x_ref[...], w1_ref[...].astype(jnp.float32),
                preferred_element_type=jnp.float32)
    h = jnp.maximum(h + b1_ref[...], 0.0)
    # Layer 2: bf16 MXU matmul, f32 accumulate / epilogue.
    h = jnp.dot(h.astype(jnp.bfloat16), w2_ref[...],
                preferred_element_type=jnp.float32)
    h = jnp.maximum(h + b2_ref[...], 0.0)
    # Layer 3 (H2 -> 1): VPU multiply + lane reduction; keep the MXU out of it.
    q = jnp.sum(h * w3_ref[...], axis=-1, keepdims=True)       # (TB, 1)
    out_ref[...] = q + b3_ref[0]                                # b3 from SMEM


def prepare_params(params):
    """One-time parameter prep (hoisted out of the per-call forward path)."""
    w1, b1, w2, b2, w3, b3 = params
    H1 = w1.shape[1]
    H2 = w2.shape[1]
    return (
        jnp.asarray(w1, jnp.bfloat16),                      # (A+S, H1)
        jnp.asarray(b1, jnp.float32).reshape(1, H1),
        jnp.asarray(w2, jnp.bfloat16),                      # (H1, H2)
        jnp.asarray(b2, jnp.float32).reshape(1, H2),
        jnp.asarray(w3, jnp.float32).reshape(1, H2),        # w3 transposed
        jnp.asarray(b3, jnp.float32).reshape(1),            # SMEM scalar
    )


def _forward_2d(x, prepped):
    """Fused 3-layer MLP on a flat (N, A+S) f32 input. Returns (N,) f32."""
    w1, b1, w2, b2, w3r, b3 = prepped
    B, Din = x.shape
    H1 = w1.shape[1]
    H2 = w2.shape[1]

    TB = _select_tile(B, _num_tensorcores())
    padded_B = _round_up(B, TB)
    if padded_B != B:
        x = jnp.pad(x, ((0, padded_B - B), (0, 0)))
    grid = (padded_B // TB,)

    flops = 2 * padded_B * (Din * H1 + H1 * H2 + H2)
    bytes_accessed = (padded_B * Din * 4                 # f32 input
                      + (Din * H1 + H1 * H2) * 2         # bf16 weights
                      + (H1 + 2 * H2 + 1) * 4            # f32 biases + w3
                      + padded_B * 4)                    # output
    cost = pl.CostEstimate(flops=flops, transcendentals=0,
                           bytes_accessed=bytes_accessed)

    q = pl.pallas_call(
        _qmlp_kernel,
        out_shape=jax.ShapeDtypeStruct((padded_B, 1), jnp.float32),
        grid=grid,
        in_specs=[
            pl.BlockSpec((TB, Din), lambda i: (i, 0)),            # x tile
            pl.BlockSpec((Din, H1), lambda i: (0, 0)),            # w1 (resident)
            pl.BlockSpec((1, H1), lambda i: (0, 0)),              # b1
            pl.BlockSpec((H1, H2), lambda i: (0, 0)),             # w2
            pl.BlockSpec((1, H2), lambda i: (0, 0)),              # b2
            pl.BlockSpec((1, H2), lambda i: (0, 0)),              # w3^T
            pl.BlockSpec(memory_space=pltpu.MemorySpace.SMEM),    # b3 scalar
        ],
        out_specs=pl.BlockSpec((TB, 1), lambda i: (i, 0)),
        compiler_params=pltpu.CompilerParams(
            dimension_semantics=("parallel",)),
        cost_estimate=cost,
    )(x, w1, b1, w2, b2, w3r, b3)

    # Padded rows hold garbage q = f(biases); slice them off.
    return q[:B, 0]


@partial(jax.jit, static_argnames=("n_sample",))
def qfunction_forward(obs, act, prepped, n_sample=1):
    """Pallas implementation of MLPQFunction.forward."""
    if n_sample > 1:
        # PyTorch: obs.unsqueeze(1).repeat(1, n_sample, 1); act is (B, n, A).
        B, S = obs.shape
        obs_b = jnp.broadcast_to(obs[:, None, :], (B, n_sample, S))
        obs2 = obs_b.reshape(B * n_sample, S)
        act2 = act.reshape(B * n_sample, act.shape[-1])
        lead = (B, n_sample)
    else:
        obs2, act2 = obs, act
        lead = (obs.shape[0],)
    # Single cheap concat (cat([act, obs], dim=-1)) -> one kernel input.
    x = jnp.concatenate([act2, obs2], axis=-1).astype(jnp.float32)
    q = _forward_2d(x, prepped)
    return q.reshape(lead)


def init_params(key, state_dim, action_dim, hidden_dim):
    """Deterministic nn.Linear-style init: U(-1/sqrt(fan_in), 1/sqrt(fan_in))."""
    sizes = [state_dim + action_dim] + list(hidden_dim) + [1]
    params = []
    for j in range(len(sizes) - 1):
        fan_in, fan_out = sizes[j], sizes[j + 1]
        key, kw, kb = jax.random.split(key, 3)
        bound = 1.0 / jnp.sqrt(jnp.float32(fan_in))
        w = jax.random.uniform(kw, (fan_in, fan_out), jnp.float32, -bound, bound)
        b = jax.random.uniform(kb, (1, fan_out), jnp.float32, -bound, bound)
        params += [w, b]
    return tuple(params)


def reference_forward(obs, act, params, n_sample=1):
    """Plain-JAX (f32) reference of the PyTorch forward for sanity checks."""
    w1, b1, w2, b2, w3, b3 = params
    if n_sample > 1:
        obs = jnp.broadcast_to(obs[:, None, :],
                               (obs.shape[0], n_sample, obs.shape[-1]))
    x = jnp.concatenate([act, obs], axis=-1)
    h = jnp.maximum(x @ w1 + b1, 0.0)
    h = jnp.maximum(h @ w2 + b2, 0.0)
    q = h @ w3 + b3
    return jnp.squeeze(q, axis=-1)


if __name__ == "__main__":
    # Small shapes consistent with the module: Q(obs, act), two hidden layers.
    B = 8
    state_dim = 12
    action_dim = 4
    hidden_dim = [32, 32]  # activation = ReLU

    key = jax.random.PRNGKey(0)
    k_obs, k_act, k_act_s, k_par = jax.random.split(key, 4)
    obs = jax.random.normal(k_obs, (B, state_dim), jnp.float32)
    act = jax.random.normal(k_act, (B, action_dim), jnp.float32)
    params = init_params(k_par, state_dim, action_dim, hidden_dim)
    prepped = prepare_params(params)   # one-time prep, reused across calls

    # n_sample == 1 path
    q = qfunction_forward(obs, act, prepped)
    jax.block_until_ready(q)
    q_ref = reference_forward(obs, act, params)
    assert q.shape == (B,), q.shape
    # bf16 weights on the MXU with f32 accumulation -> loosened tolerance.
    assert jnp.allclose(q, q_ref, atol=5e-2, rtol=5e-2), (q, q_ref)

    # n_sample > 1 path (obs broadcast across samples, per the PyTorch module)
    n_sample = 3
    act_s = jax.random.normal(k_act_s, (B, n_sample, action_dim), jnp.float32)
    q_s = qfunction_forward(obs, act_s, prepped, n_sample=n_sample)
    jax.block_until_ready(q_s)
    q_s_ref = reference_forward(obs, act_s, params, n_sample=n_sample)
    assert q_s.shape == (B, n_sample), q_s.shape
    assert jnp.allclose(q_s, q_s_ref, atol=5e-2, rtol=5e-2), (q_s, q_s_ref)

    print("KERNEL_OK")
</pallas_src>

<mosaic_0001>
module attributes {stable_mosaic.version = 11 : i64} {
  func.func @_qmlp_kernel(%arg0: i32, %arg1: memref<16x16xf32, #tpu.memory_space<vmem>>, %arg2: memref<16x32xbf16, #tpu.memory_space<vmem>>, %arg3: memref<1x32xf32, #tpu.memory_space<vmem>>, %arg4: memref<32x32xbf16, #tpu.memory_space<vmem>>, %arg5: memref<1x32xf32, #tpu.memory_space<vmem>>, %arg6: memref<1x32xf32, #tpu.memory_space<vmem>>, %arg7: memref<1xf32, #tpu.memory_space<smem>>, %arg8: memref<16x1xf32, #tpu.memory_space<vmem>>) attributes {dimension_semantics = [#tpu.dimension_semantics<parallel>], iteration_bounds = array<i64: 1>, scalar_prefetch = 0 : i64, scratch_operands = 0 : i64, tpu.core_type = #tpu.core_type<tc>, window_params = [{transform_indices = @transform_0, window_bounds = array<i64: 16, 16>}, {pipeline_mode = #tpu.pipeline_mode<synchronous>, transform_indices = @transform_1, window_bounds = array<i64: 16, 32>}, {pipeline_mode = #tpu.pipeline_mode<synchronous>, transform_indices = @transform_2, window_bounds = array<i64: 1, 32>}, {pipeline_mode = #tpu.pipeline_mode<synchronous>, transform_indices = @transform_3, window_bounds = array<i64: 32, 32>}, {pipeline_mode = #tpu.pipeline_mode<synchronous>, transform_indices = @transform_4, window_bounds = array<i64: 1, 32>}, {pipeline_mode = #tpu.pipeline_mode<synchronous>, transform_indices = @transform_5, window_bounds = array<i64: 1, 32>}, {transform_indices = @transform_6, window_bounds = array<i64: 1>}, {transform_indices = @transform_7, window_bounds = array<i64: 16, 1>}]} {
    %c0 = arith.constant 0 : index
    %c0_0 = arith.constant 0 : index
    %0 = vector.load %arg1[%c0, %c0_0] : memref<16x16xf32, #tpu.memory_space<vmem>>, vector<16x16xf32>
    %c0_1 = arith.constant 0 : index
    %c0_2 = arith.constant 0 : index
    %1 = vector.load %arg2[%c0_1, %c0_2] : memref<16x32xbf16, #tpu.memory_space<vmem>>, vector<16x32xbf16>
    %2 = arith.extf %1 : vector<16x32xbf16> to vector<16x32xf32>
    %cst = arith.constant dense<0.000000e+00> : vector<16x32xf32>
    %3 = tpu.matmul %0, %2, %cst {dimension_numbers = #tpu.dot_dimension_numbers<[1], [0], [0], [1], [0, 0, 1, 1], [], []>} : vector<16x16xf32>, vector<16x32xf32>, vector<16x32xf32> -> vector<16x32xf32>
    %c0_3 = arith.constant 0 : index
    %c0_4 = arith.constant 0 : index
    %4 = vector.load %arg3[%c0_3, %c0_4] : memref<1x32xf32, #tpu.memory_space<vmem>>, vector<1x32xf32>
    %5 = vector.broadcast %4 : vector<1x32xf32> to vector<16x32xf32>
    %6 = arith.addf %3, %5 : vector<16x32xf32>
    %cst_5 = arith.constant 0.000000e+00 : f32
    %7 = vector.broadcast %cst_5 : f32 to vector<16x32xf32>
    %8 = arith.maximumf %6, %7 : vector<16x32xf32>
    %9 = arith.truncf %8 : vector<16x32xf32> to vector<16x32xbf16>
    %c0_6 = arith.constant 0 : index
    %c0_7 = arith.constant 0 : index
    %10 = vector.load %arg4[%c0_6, %c0_7] : memref<32x32xbf16, #tpu.memory_space<vmem>>, vector<32x32xbf16>
    %cst_8 = arith.constant dense<0.000000e+00> : vector<16x32xf32>
    %11 = tpu.matmul %9, %10, %cst_8 {dimension_numbers = #tpu.dot_dimension_numbers<[1], [0], [0], [1], [0, 0, 1, 1], [], []>} : vector<16x32xbf16>, vector<32x32xbf16>, vector<16x32xf32> -> vector<16x32xf32>
    %c0_9 = arith.constant 0 : index
    %c0_10 = arith.constant 0 : index
    %12 = vector.load %arg5[%c0_9, %c0_10] : memref<1x32xf32, #tpu.memory_space<vmem>>, vector<1x32xf32>
    %13 = vector.broadcast %12 : vector<1x32xf32> to vector<16x32xf32>
    %14 = arith.addf %11, %13 : vector<16x32xf32>
    %cst_11 = arith.constant 0.000000e+00 : f32
    %15 = vector.broadcast %cst_11 : f32 to vector<16x32xf32>
    %16 = arith.maximumf %14, %15 : vector<16x32xf32>
    %c0_12 = arith.constant 0 : index
    %c0_13 = arith.constant 0 : index
    %17 = vector.load %arg6[%c0_12, %c0_13] : memref<1x32xf32, #tpu.memory_space<vmem>>, vector<1x32xf32>
    %18 = vector.broadcast %17 : vector<1x32xf32> to vector<16x32xf32>
    %19 = arith.mulf %16, %18 : vector<16x32xf32>
    %cst_14 = arith.constant dense<0.000000e+00> : vector<16xf32>
    %20 = vector.multi_reduction <add>, %19, %cst_14 [1] : vector<16x32xf32> to vector<16xf32>
    %21 = vector.shape_cast %20 : vector<16xf32> to vector<16x1xf32>
    %c0_15 = arith.constant 0 : index
    %22 = memref.load %arg7[%c0_15] : memref<1xf32, #tpu.memory_space<smem>>
    %23 = vector.broadcast %22 : f32 to vector<16x1xf32>
    %24 = arith.addf %21, %23 : vector<16x1xf32>
    %c0_16 = arith.constant 0 : index
    %c0_17 = arith.constant 0 : index
    %25 = vector.load %arg8[%c0_16, %c0_17] : memref<16x1xf32, #tpu.memory_space<vmem>>, vector<16x1xf32>
    tpu.vector_store %arg8[%c0_16, %c0_17], %24 {strides = array<i32>} : memref<16x1xf32, #tpu.memory_space<vmem>>, vector<16x1xf32>,
    return
  }
  func.func @transform_0(%arg0: i32) -> (i32, i32) {
    %c0_i32 = arith.constant 0 : i32
    %c0_i32_0 = arith.constant 0 : i32
    return %arg0, %c0_i32 : i32, i32
  }
  func.func @transform_1(%arg0: i32) -> (i32, i32) {
    %c0_i32 = arith.constant 0 : i32
    %c0_i32_0 = arith.constant 0 : i32
    %c0_i32_1 = arith.constant 0 : i32
    return %c0_i32, %c0_i32_0 : i32, i32
  }
  func.func @transform_2(%arg0: i32) -> (i32, i32) {
    %c0_i32 = arith.constant 0 : i32
    %c0_i32_0 = arith.constant 0 : i32
    %c0_i32_1 = arith.constant 0 : i32
    return %c0_i32, %c0_i32_0 : i32, i32
  }
  func.func @transform_3(%arg0: i32) -> (i32, i32) {
    %c0_i32 = arith.constant 0 : i32
    %c0_i32_0 = arith.constant 0 : i32
    %c0_i32_1 = arith.constant 0 : i32
    return %c0_i32, %c0_i32_0 : i32, i32
  }
  func.func @transform_4(%arg0: i32) -> (i32, i32) {
    %c0_i32 = arith.constant 0 : i32
    %c0_i32_0 = arith.constant 0 : i32
    %c0_i32_1 = arith.constant 0 : i32
    return %c0_i32, %c0_i32_0 : i32, i32
  }
  func.func @transform_5(%arg0: i32) -> (i32, i32) {
    %c0_i32 = arith.constant 0 : i32
    %c0_i32_0 = arith.constant 0 : i32
    %c0_i32_1 = arith.constant 0 : i32
    return %c0_i32, %c0_i32_0 : i32, i32
  }
  func.func @transform_6(%arg0: i32) -> i32 {
    %c0_i32 = arith.constant 0 : i32
    %c0_i32_0 = arith.constant 0 : i32
    return %c0_i32 : i32
  }
  func.func @transform_7(%arg0: i32) -> (i32, i32) {
    %c0_i32 = arith.constant 0 : i32
    %c0_i32_0 = arith.constant 0 : i32
    return %arg0, %c0_i32 : i32, i32
  }
}

</mosaic_0001>

<bundles_post_ra>
// kernel: qfunction_forward.1
= control target key start
LH: loop header
LB: loop body
LE: loop exit
PB: predicated region body
PF: predicated region fallthrough
CT: control target
= control target key end

     0   :  { %vm41_vm0 = vcmask 130048   ;;  %v264_v4 = vmov 0.0   ;;  %vm265_vm1 = vmmov 0   ;;  %vm149_vm2 = vcmask 261120   ;;  %s342_s1 = inlined_call_operand.vmem [shape: bf16[16,32], index: 1, kind: input, shape index: {}]   ;;  %s343_s0 = inlined_call_operand.vmem [shape: f32[16,16], index: 0, kind: input, shape index: {}]   ;;  %s344_s3 = inlined_call_operand.vmem [shape: bf16[32,32], index: 3, kind: input, shape index: {}]   ;;  %s345_s2 = inlined_call_operand.vmem [shape: f32[1,32], index: 2, kind: input, shape index: {}]   ;;  %s346_s4 = inlined_call_operand.vmem [shape: f32[1,32], index: 4, kind: input, shape index: {}]   ;;  %s347_s5 = inlined_call_operand.vmem [shape: f32[1,32], index: 5, kind: input, shape index: {}]   ;;  %s348_s6 = inlined_call_operand.<no memory space> [shape: f32[1], index: 6, kind: input, shape index: {}]   ;;  %s349_s7 = inlined_call_operand.vmem [shape: f32[16,1], index: 7, kind: output, shape index: {}]  }
   0x1   :  { %v231_v0 = vld [vmem:[%s342_s1] sm:$0xff]   ;;  %v29_v2 = vld [vmem:[%s343_s0 + $0x8] sm:$0xff]  ;;  %248 = vmatprep.subr.bf16.mxu1 %v264_v4  ;;  %252 = vmatprep.mubr.msk.bf16.mxu1 %vm265_vm1, %v264_v4  ;;  %v212_v28 = vstv %s348_s6  ;;  %vm215_vm3 = vcmask 7168  }
   0x2   :  { %v28_v1 = vld [vmem:[%s343_s0] sm:$0xff]  ;;  %257 = vmatprep.subr.bf16.mxu0 %v231_v0  ;;  %v263_v5 = vld [vmem:[%s344_s3 + $0x8] sm:$0xff]  }
   0x3   :  { %245 = vmatprep.mubr.msk.f32.mxu0 %vm41_vm0, %v28_v1  ;;  %259 = vmatpush3.bf16.msra.mxu0 %v231_v0  ;;  %v262_v3 = vld [vmem:[%s344_s3] sm:$0xff]  }
   0x4   :  { %249 = vmatpush3.bf16.msra.mxu1 %v262_v3  ;;  %v222_v6 = vld [vmem:[%s345_s2] ss:$0 sm:$0xff] }
   0x5   :  { %250 = vmatprep.subr.bf16.mxu1 %v264_v4  ;;  %v225_v14 = vld [vmem:[%s346_s4] ss:$0 sm:$0xff] }
   0x6   :  { %246 = vmatmul.mubr.msk.f32.vlgmr.msra.gmra.mrb[0].mxu0 %vm41_vm0, %v29_v2  ;;  %v229_v19 = vld [vmem:[%s347_s5] ss:$0 sm:$0xff] }
   0x8   :  { %251 = vmatpush3.bf16.msra.mxu1 %v263_v5 }
  0xd9   :  { %v247_v7 = vpop.f32.mrb[0].mxu0 }
  0xda   :  { %v120_v8 = vadd.f32 %v247_v7, %v222_v6  ;;  %v114_v9 = vpop.f32.mrb[1].mxu0 }
  0xdb   :  { %v115_v10 = vadd.f32 %v222_v6, %v114_v9 }
  0xdc   :  { %v124_v11 = vmax.f32 %v120_v8, 0.0 }
  0xdd   :  { %v123_v12 = vmax.f32 %v115_v10, 0.0 }
  0xdf   :  { %v125_v13 = vpack.c.bf16 %v124_v11, %v123_v12 }
  0xe1   :  { %253 = vmatmul.mubr.msk.bf16.vlgmr.msra.gmra.mrb[0].mxu1 %vm149_vm2, %v125_v13 }
 0x1b4   :  { %v187_v15 = vpop.f32.mrb[0].mxu1 }
 0x1b5   :  { %v188_v16 = vadd.f32 %v225_v14, %v187_v15  ;;  %v254_v17 = vpop.f32.mrb[1].mxu1 }
 0x1b6   :  { %v190_v18 = vpop.f32.mrb[2].mxu1 }
 0x1b7   :  { %v194_v20 = vmax.f32 %v188_v16, 0.0  ;;  %v191_v21 = vadd.f32 %v225_v14, %v190_v18  ;;  %v255_v22 = vpop.f32.mrb[3].mxu1 }
 0x1b9   :  { %v195_v23 = vmax.f32 %v191_v21, 0.0  ;;  %v203_v24 = vmul.f32 %v229_v19, %v194_v20 }
 0x1bb   :  { %v205_v25 = vsel %vm149_vm2, %v203_v24, 0.0  ;;  %v204_v26 = vmul.f32 %v229_v19, %v195_v23 }
 0x1bc   :  { %206 = vadd.xlane.f32.xlu0 %v205_v25 }
 0x1bd   :  { %v208_v27 = vsel %vm149_vm2, %v204_v26, 0.0 }
 0x1c0   :  { %209 = vadd.xlane.f32.xlu0 %v208_v27 }
 0x249   :  { %v207_v29 = vpop.xlane.xlu0 %206 }
 0x24a   :  { %v213_v30 = vadd.f32 %v212_v28, %v207_v29 }
 0x24c   :  { %216 = vst.msk [vmem:[%s349_s7] sm:$0xff] %vm215_vm3, %v213_v30 }
 0x24d   :  { %v210_v31 = vpop.xlane.xlu0 %209 }
 0x24e   :  { %v214_v32 = vadd.f32 %v212_v28, %v210_v31 }
 0x250   :  { %217 = vst.msk [vmem:[%s349_s7 + $0x8] sm:$0xff] %vm215_vm3, %v214_v32 }

</bundles_post_ra>
